<compile_context>
chip_gen: v7x
topology: tpu7x:2x2x1
jax: 0.10.0
libtpu: 0.0.40
codegen_flags: <defaults>
</compile_context>

<pallas_src>
import math
import functools

import jax
import jax.numpy as jnp
from jax.experimental import pallas as pl
from jax.experimental.pallas import tpu as pltpu

H_SIZE = 256
LANE = 128


def _round_up(v, m):
    return ((v + m - 1) // m) * m


def _softsign(x):
    # x / (1 + |x|) with the reciprocal on the EUP (approx vrcp) -> free slot.
    return x * pl.reciprocal(1.0 + jnp.abs(x), approx=True)


# ----------------------------------------------------------------------------
# Fused kernel: all 6 layers in one body
# ----------------------------------------------------------------------------
def softsign_actor_kernel(x_ref,
                          w1, b1, w2, b2, w3, b3, w4, b4, w5, b5, w6, b6,
                          out_ref):
    def dense(h, w_ref, b_ref):
        # bf16 MXU operands, f32 accumulation, f32 bias add.
        return (jnp.dot(h.astype(jnp.bfloat16), w_ref[...],
                        preferred_element_type=jnp.float32)
                + b_ref[...])

    h = x_ref[...]                                  # f32 (bm, S)
    h = _softsign(dense(h, w1, b1))
    h = _softsign(dense(h, w2, b2))
    h = _softsign(dense(h, w3, b3))
    h = jnp.maximum(dense(h, w4, b4), 0.0)
    h = jnp.maximum(dense(h, w5, b5), 0.0)
    out_ref[...] = jnp.tanh(dense(h, w6, b6))


# ----------------------------------------------------------------------------
# Wrapper
# ----------------------------------------------------------------------------
def softsign_actor_forward(x, params, *, block_m=512):
    """x: (B, state_dim) f32; params: list of 6 (W, b) with W:(in,out), b:(1,out)."""
    B, S = x.shape
    action_dim = params[5][0].shape[1]
    out_pad = max(LANE, _round_up(action_dim, LANE))   # exactly 128 for small dims

    # Lane-dense output layer: pad columns with zeros (tanh(0)=0, sliced off below).
    w6, b6 = params[5]
    w6p = jnp.zeros((H_SIZE, out_pad), jnp.float32).at[:, :action_dim].set(w6)
    b6p = jnp.zeros((1, out_pad), jnp.float32).at[:, :action_dim].set(b6)

    # Weights -> bf16 (MXU operands, halves weight DMA); biases stay f32.
    flat = []
    for w, b in params[:5]:
        flat.extend([w.astype(jnp.bfloat16), b.astype(jnp.float32)])
    flat.extend([w6p.astype(jnp.bfloat16), b6p])

    # Batch tiling: single "parallel" grid axis.  For B >= 16, make >= 2 grid
    # steps so v7x's two TensorCores can split the batch; per-step overhead is
    # negligible on single-TC v5e/v6e.
    if B < 16:
        bm = max(8, _round_up(B, 8)) if B > 8 else B
    else:
        bm = min(block_m, max(8, _round_up((B + 1) // 2, 8)))
    b_pad = _round_up(B, bm)
    xp = x if b_pad == B else jnp.pad(x, ((0, b_pad - B), (0, 0)))
    grid = (b_pad // bm,)

    # Weights/biases: full-array blocks, constant index_map -> fetched once.
    weight_specs = [pl.BlockSpec(a.shape, lambda i: (0, 0)) for a in flat]

    out = pl.pallas_call(
        softsign_actor_kernel,
        out_shape=jax.ShapeDtypeStruct((b_pad, out_pad), jnp.float32),
        grid=grid,
        in_specs=[pl.BlockSpec((bm, S), lambda i: (i, 0))] + weight_specs,
        out_specs=pl.BlockSpec((bm, out_pad), lambda i: (i, 0)),
        compiler_params=pltpu.CompilerParams(
            dimension_semantics=("parallel",)),
    )(xp, *flat)

    return out[:B, :action_dim]


# ----------------------------------------------------------------------------
# Parameter construction (PyTorch-Linear-style uniform init; values only need
# to be valid for a forward-semantics check).
# ----------------------------------------------------------------------------
def make_actor_params(key, state_dim, action_dim):
    dims = [state_dim, H_SIZE, H_SIZE, H_SIZE, H_SIZE, H_SIZE, action_dim]
    keys = jax.random.split(key, 12)
    params = []
    for li in range(6):
        bound = 1.0 / math.sqrt(dims[li])
        w = jax.random.uniform(keys[2 * li], (dims[li], dims[li + 1]),
                               jnp.float32, -bound, bound)
        b = jax.random.uniform(keys[2 * li + 1], (1, dims[li + 1]),
                               jnp.float32, -bound, bound)
        params.append((w, b))
    return params


def reference_forward(x, params):
    """Pure-JAX f32 reference of the PyTorch forward (for correctness check)."""
    h = x
    for li, (w, b) in enumerate(params):
        h = h @ w + b
        if li < 3:
            h = h / (1.0 + jnp.abs(h))      # softsign
        elif li < 5:
            h = jnp.maximum(h, 0.0)         # relu
        else:
            h = jnp.tanh(h)                 # tanh
    return h


# ----------------------------------------------------------------------------
if __name__ == "__main__":
    STATE_DIM, ACTION_DIM = 32, 6

    key = jax.random.PRNGKey(0)
    k_params, k_x1, k_x2 = jax.random.split(key, 3)
    params = make_actor_params(k_params, STATE_DIM, ACTION_DIM)

    fwd = jax.jit(functools.partial(softsign_actor_forward, block_m=512))

    # Small (latency-regime) batch.
    B1 = 8
    x1 = jax.random.normal(k_x1, (B1, STATE_DIM), jnp.float32)
    y1 = fwd(x1, params)
    jax.block_until_ready(y1)
    y1_ref = reference_forward(x1, params)
    assert y1.shape == (B1, ACTION_DIM)
    assert jnp.all(jnp.isfinite(y1))
    # bf16 MXU operands + approx reciprocal -> relaxed tolerance vs f32 ref.
    assert jnp.allclose(y1, y1_ref, atol=3e-2, rtol=0.0), "mismatch vs reference (B=8)"

    # Batch that exercises the multi-step (dual-TC-friendly) grid path.
    B2 = 40
    x2 = jax.random.normal(k_x2, (B2, STATE_DIM), jnp.float32)
    y2 = fwd(x2, params)
    jax.block_until_ready(y2)
    y2_ref = reference_forward(x2, params)
    assert y2.shape == (B2, ACTION_DIM)
    assert jnp.all(jnp.isfinite(y2))
    assert jnp.allclose(y2, y2_ref, atol=3e-2, rtol=0.0), "mismatch vs reference (B=40)"

    print("KERNEL_OK")
</pallas_src>

<mosaic_0001>
module attributes {stable_mosaic.version = 11 : i64} {
  func.func @softsign_actor_kernel(%arg0: i32, %arg1: memref<8x32xf32, #tpu.memory_space<vmem>>, %arg2: memref<32x256xbf16, #tpu.memory_space<vmem>>, %arg3: memref<1x256xf32, #tpu.memory_space<vmem>>, %arg4: memref<256x256xbf16, #tpu.memory_space<vmem>>, %arg5: memref<1x256xf32, #tpu.memory_space<vmem>>, %arg6: memref<256x256xbf16, #tpu.memory_space<vmem>>, %arg7: memref<1x256xf32, #tpu.memory_space<vmem>>, %arg8: memref<256x256xbf16, #tpu.memory_space<vmem>>, %arg9: memref<1x256xf32, #tpu.memory_space<vmem>>, %arg10: memref<256x256xbf16, #tpu.memory_space<vmem>>, %arg11: memref<1x256xf32, #tpu.memory_space<vmem>>, %arg12: memref<256x128xbf16, #tpu.memory_space<vmem>>, %arg13: memref<1x128xf32, #tpu.memory_space<vmem>>, %arg14: memref<8x128xf32, #tpu.memory_space<vmem>>) attributes {dimension_semantics = [#tpu.dimension_semantics<parallel>], iteration_bounds = array<i64: 1>, scalar_prefetch = 0 : i64, scratch_operands = 0 : i64, tpu.core_type = #tpu.core_type<tc>, window_params = [{transform_indices = @transform_0, window_bounds = array<i64: 8, 32>}, {pipeline_mode = #tpu.pipeline_mode<synchronous>, transform_indices = @transform_1, window_bounds = array<i64: 32, 256>}, {pipeline_mode = #tpu.pipeline_mode<synchronous>, transform_indices = @transform_2, window_bounds = array<i64: 1, 256>}, {pipeline_mode = #tpu.pipeline_mode<synchronous>, transform_indices = @transform_3, window_bounds = array<i64: 256, 256>}, {pipeline_mode = #tpu.pipeline_mode<synchronous>, transform_indices = @transform_4, window_bounds = array<i64: 1, 256>}, {pipeline_mode = #tpu.pipeline_mode<synchronous>, transform_indices = @transform_5, window_bounds = array<i64: 256, 256>}, {pipeline_mode = #tpu.pipeline_mode<synchronous>, transform_indices = @transform_6, window_bounds = array<i64: 1, 256>}, {pipeline_mode = #tpu.pipeline_mode<synchronous>, transform_indices = @transform_7, window_bounds = array<i64: 256, 256>}, {pipeline_mode = #tpu.pipeline_mode<synchronous>, transform_indices = @transform_8, window_bounds = array<i64: 1, 256>}, {pipeline_mode = #tpu.pipeline_mode<synchronous>, transform_indices = @transform_9, window_bounds = array<i64: 256, 256>}, {pipeline_mode = #tpu.pipeline_mode<synchronous>, transform_indices = @transform_10, window_bounds = array<i64: 1, 256>}, {pipeline_mode = #tpu.pipeline_mode<synchronous>, transform_indices = @transform_11, window_bounds = array<i64: 256, 128>}, {pipeline_mode = #tpu.pipeline_mode<synchronous>, transform_indices = @transform_12, window_bounds = array<i64: 1, 128>}, {transform_indices = @transform_13, window_bounds = array<i64: 8, 128>}]} {
    %c0 = arith.constant 0 : index
    %c0_0 = arith.constant 0 : index
    %0 = vector.load %arg1[%c0, %c0_0] : memref<8x32xf32, #tpu.memory_space<vmem>>, vector<8x32xf32>
    %1 = arith.truncf %0 : vector<8x32xf32> to vector<8x32xbf16>
    %c0_1 = arith.constant 0 : index
    %c0_2 = arith.constant 0 : index
    %2 = vector.load %arg2[%c0_1, %c0_2] : memref<32x256xbf16, #tpu.memory_space<vmem>>, vector<32x256xbf16>
    %cst = arith.constant dense<0.000000e+00> : vector<8x256xf32>
    %3 = tpu.matmul %1, %2, %cst {dimension_numbers = #tpu.dot_dimension_numbers<[1], [0], [0], [1], [0, 0, 1, 1], [], []>} : vector<8x32xbf16>, vector<32x256xbf16>, vector<8x256xf32> -> vector<8x256xf32>
    %c0_3 = arith.constant 0 : index
    %c0_4 = arith.constant 0 : index
    %4 = vector.load %arg3[%c0_3, %c0_4] : memref<1x256xf32, #tpu.memory_space<vmem>>, vector<1x256xf32>
    %5 = vector.broadcast %4 : vector<1x256xf32> to vector<8x256xf32>
    %6 = arith.addf %3, %5 : vector<8x256xf32>
    %7 = math.absf %6 : vector<8x256xf32>
    %cst_5 = arith.constant 1.000000e+00 : f32
    %8 = vector.broadcast %cst_5 : f32 to vector<8x256xf32>
    %9 = arith.addf %8, %7 : vector<8x256xf32>
    %10 = tpu.reciprocal %9 {approx = true} : vector<8x256xf32> -> vector<8x256xf32>
    %11 = arith.mulf %6, %10 : vector<8x256xf32>
    %12 = arith.truncf %11 : vector<8x256xf32> to vector<8x256xbf16>
    %c0_6 = arith.constant 0 : index
    %c0_7 = arith.constant 0 : index
    %13 = vector.load %arg4[%c0_6, %c0_7] : memref<256x256xbf16, #tpu.memory_space<vmem>>, vector<256x256xbf16>
    %cst_8 = arith.constant dense<0.000000e+00> : vector<8x256xf32>
    %14 = tpu.matmul %12, %13, %cst_8 {dimension_numbers = #tpu.dot_dimension_numbers<[1], [0], [0], [1], [0, 0, 1, 1], [], []>} : vector<8x256xbf16>, vector<256x256xbf16>, vector<8x256xf32> -> vector<8x256xf32>
    %c0_9 = arith.constant 0 : index
    %c0_10 = arith.constant 0 : index
    %15 = vector.load %arg5[%c0_9, %c0_10] : memref<1x256xf32, #tpu.memory_space<vmem>>, vector<1x256xf32>
    %16 = vector.broadcast %15 : vector<1x256xf32> to vector<8x256xf32>
    %17 = arith.addf %14, %16 : vector<8x256xf32>
    %18 = math.absf %17 : vector<8x256xf32>
    %cst_11 = arith.constant 1.000000e+00 : f32
    %19 = vector.broadcast %cst_11 : f32 to vector<8x256xf32>
    %20 = arith.addf %19, %18 : vector<8x256xf32>
    %21 = tpu.reciprocal %20 {approx = true} : vector<8x256xf32> -> vector<8x256xf32>
    %22 = arith.mulf %17, %21 : vector<8x256xf32>
    %23 = arith.truncf %22 : vector<8x256xf32> to vector<8x256xbf16>
    %c0_12 = arith.constant 0 : index
    %c0_13 = arith.constant 0 : index
    %24 = vector.load %arg6[%c0_12, %c0_13] : memref<256x256xbf16, #tpu.memory_space<vmem>>, vector<256x256xbf16>
    %cst_14 = arith.constant dense<0.000000e+00> : vector<8x256xf32>
    %25 = tpu.matmul %23, %24, %cst_14 {dimension_numbers = #tpu.dot_dimension_numbers<[1], [0], [0], [1], [0, 0, 1, 1], [], []>} : vector<8x256xbf16>, vector<256x256xbf16>, vector<8x256xf32> -> vector<8x256xf32>
    %c0_15 = arith.constant 0 : index
    %c0_16 = arith.constant 0 : index
    %26 = vector.load %arg7[%c0_15, %c0_16] : memref<1x256xf32, #tpu.memory_space<vmem>>, vector<1x256xf32>
    %27 = vector.broadcast %26 : vector<1x256xf32> to vector<8x256xf32>
    %28 = arith.addf %25, %27 : vector<8x256xf32>
    %29 = math.absf %28 : vector<8x256xf32>
    %cst_17 = arith.constant 1.000000e+00 : f32
    %30 = vector.broadcast %cst_17 : f32 to vector<8x256xf32>
    %31 = arith.addf %30, %29 : vector<8x256xf32>
    %32 = tpu.reciprocal %31 {approx = true} : vector<8x256xf32> -> vector<8x256xf32>
    %33 = arith.mulf %28, %32 : vector<8x256xf32>
    %34 = arith.truncf %33 : vector<8x256xf32> to vector<8x256xbf16>
    %c0_18 = arith.constant 0 : index
    %c0_19 = arith.constant 0 : index
    %35 = vector.load %arg8[%c0_18, %c0_19] : memref<256x256xbf16, #tpu.memory_space<vmem>>, vector<256x256xbf16>
    %cst_20 = arith.constant dense<0.000000e+00> : vector<8x256xf32>
    %36 = tpu.matmul %34, %35, %cst_20 {dimension_numbers = #tpu.dot_dimension_numbers<[1], [0], [0], [1], [0, 0, 1, 1], [], []>} : vector<8x256xbf16>, vector<256x256xbf16>, vector<8x256xf32> -> vector<8x256xf32>
    %c0_21 = arith.constant 0 : index
    %c0_22 = arith.constant 0 : index
    %37 = vector.load %arg9[%c0_21, %c0_22] : memref<1x256xf32, #tpu.memory_space<vmem>>, vector<1x256xf32>
    %38 = vector.broadcast %37 : vector<1x256xf32> to vector<8x256xf32>
    %39 = arith.addf %36, %38 : vector<8x256xf32>
    %cst_23 = arith.constant 0.000000e+00 : f32
    %40 = vector.broadcast %cst_23 : f32 to vector<8x256xf32>
    %41 = arith.maximumf %39, %40 : vector<8x256xf32>
    %42 = arith.truncf %41 : vector<8x256xf32> to vector<8x256xbf16>
    %c0_24 = arith.constant 0 : index
    %c0_25 = arith.constant 0 : index
    %43 = vector.load %arg10[%c0_24, %c0_25] : memref<256x256xbf16, #tpu.memory_space<vmem>>, vector<256x256xbf16>
    %cst_26 = arith.constant dense<0.000000e+00> : vector<8x256xf32>
    %44 = tpu.matmul %42, %43, %cst_26 {dimension_numbers = #tpu.dot_dimension_numbers<[1], [0], [0], [1], [0, 0, 1, 1], [], []>} : vector<8x256xbf16>, vector<256x256xbf16>, vector<8x256xf32> -> vector<8x256xf32>
    %c0_27 = arith.constant 0 : index
    %c0_28 = arith.constant 0 : index
    %45 = vector.load %arg11[%c0_27, %c0_28] : memref<1x256xf32, #tpu.memory_space<vmem>>, vector<1x256xf32>
    %46 = vector.broadcast %45 : vector<1x256xf32> to vector<8x256xf32>
    %47 = arith.addf %44, %46 : vector<8x256xf32>
    %cst_29 = arith.constant 0.000000e+00 : f32
    %48 = vector.broadcast %cst_29 : f32 to vector<8x256xf32>
    %49 = arith.maximumf %47, %48 : vector<8x256xf32>
    %50 = arith.truncf %49 : vector<8x256xf32> to vector<8x256xbf16>
    %c0_30 = arith.constant 0 : index
    %c0_31 = arith.constant 0 : index
    %51 = vector.load %arg12[%c0_30, %c0_31] : memref<256x128xbf16, #tpu.memory_space<vmem>>, vector<256x128xbf16>
    %cst_32 = arith.constant dense<0.000000e+00> : vector<8x128xf32>
    %52 = tpu.matmul %50, %51, %cst_32 {dimension_numbers = #tpu.dot_dimension_numbers<[1], [0], [0], [1], [0, 0, 1, 1], [], []>} : vector<8x256xbf16>, vector<256x128xbf16>, vector<8x128xf32> -> vector<8x128xf32>
    %c0_33 = arith.constant 0 : index
    %c0_34 = arith.constant 0 : index
    %53 = vector.load %arg13[%c0_33, %c0_34] : memref<1x128xf32, #tpu.memory_space<vmem>>, vector<1x128xf32>
    %54 = vector.broadcast %53 : vector<1x128xf32> to vector<8x128xf32>
    %55 = arith.addf %52, %54 : vector<8x128xf32>
    %56 = math.tanh %55 : vector<8x128xf32>
    %c0_35 = arith.constant 0 : index
    %c0_36 = arith.constant 0 : index
    %57 = vector.load %arg14[%c0_35, %c0_36] : memref<8x128xf32, #tpu.memory_space<vmem>>, vector<8x128xf32>
    tpu.vector_store %arg14[%c0_35, %c0_36], %56 {strides = array<i32>} : memref<8x128xf32, #tpu.memory_space<vmem>>, vector<8x128xf32>,
    return
  }
  func.func @transform_0(%arg0: i32) -> (i32, i32) {
    %c0_i32 = arith.constant 0 : i32
    %c0_i32_0 = arith.constant 0 : i32
    return %arg0, %c0_i32 : i32, i32
  }
  func.func @transform_1(%arg0: i32) -> (i32, i32) {
    %c0_i32 = arith.constant 0 : i32
    %c0_i32_0 = arith.constant 0 : i32
    %c0_i32_1 = arith.constant 0 : i32
    return %c0_i32, %c0_i32_0 : i32, i32
  }
  func.func @transform_2(%arg0: i32) -> (i32, i32) {
    %c0_i32 = arith.constant 0 : i32
    %c0_i32_0 = arith.constant 0 : i32
    %c0_i32_1 = arith.constant 0 : i32
    return %c0_i32, %c0_i32_0 : i32, i32
  }
  func.func @transform_3(%arg0: i32) -> (i32, i32) {
    %c0_i32 = arith.constant 0 : i32
    %c0_i32_0 = arith.constant 0 : i32
    %c0_i32_1 = arith.constant 0 : i32
    return %c0_i32, %c0_i32_0 : i32, i32
  }
  func.func @transform_4(%arg0: i32) -> (i32, i32) {
    %c0_i32 = arith.constant 0 : i32
    %c0_i32_0 = arith.constant 0 : i32
    %c0_i32_1 = arith.constant 0 : i32
    return %c0_i32, %c0_i32_0 : i32, i32
  }
  func.func @transform_5(%arg0: i32) -> (i32, i32) {
    %c0_i32 = arith.constant 0 : i32
    %c0_i32_0 = arith.constant 0 : i32
    %c0_i32_1 = arith.constant 0 : i32
    return %c0_i32, %c0_i32_0 : i32, i32
  }
  func.func @transform_6(%arg0: i32) -> (i32, i32) {
    %c0_i32 = arith.constant 0 : i32
    %c0_i32_0 = arith.constant 0 : i32
    %c0_i32_1 = arith.constant 0 : i32
    return %c0_i32, %c0_i32_0 : i32, i32
  }
  func.func @transform_7(%arg0: i32) -> (i32, i32) {
    %c0_i32 = arith.constant 0 : i32
    %c0_i32_0 = arith.constant 0 : i32
    %c0_i32_1 = arith.constant 0 : i32
    return %c0_i32, %c0_i32_0 : i32, i32
  }
  func.func @transform_8(%arg0: i32) -> (i32, i32) {
    %c0_i32 = arith.constant 0 : i32
    %c0_i32_0 = arith.constant 0 : i32
    %c0_i32_1 = arith.constant 0 : i32
    return %c0_i32, %c0_i32_0 : i32, i32
  }
  func.func @transform_9(%arg0: i32) -> (i32, i32) {
    %c0_i32 = arith.constant 0 : i32
    %c0_i32_0 = arith.constant 0 : i32
    %c0_i32_1 = arith.constant 0 : i32
    return %c0_i32, %c0_i32_0 : i32, i32
  }
  func.func @transform_10(%arg0: i32) -> (i32, i32) {
    %c0_i32 = arith.constant 0 : i32
    %c0_i32_0 = arith.constant 0 : i32
    %c0_i32_1 = arith.constant 0 : i32
    return %c0_i32, %c0_i32_0 : i32, i32
  }
  func.func @transform_11(%arg0: i32) -> (i32, i32) {
    %c0_i32 = arith.constant 0 : i32
    %c0_i32_0 = arith.constant 0 : i32
    %c0_i32_1 = arith.constant 0 : i32
    return %c0_i32, %c0_i32_0 : i32, i32
  }
  func.func @transform_12(%arg0: i32) -> (i32, i32) {
    %c0_i32 = arith.constant 0 : i32
    %c0_i32_0 = arith.constant 0 : i32
    %c0_i32_1 = arith.constant 0 : i32
    return %c0_i32, %c0_i32_0 : i32, i32
  }
  func.func @transform_13(%arg0: i32) -> (i32, i32) {
    %c0_i32 = arith.constant 0 : i32
    %c0_i32_0 = arith.constant 0 : i32
    return %arg0, %c0_i32 : i32, i32
  }
}

</mosaic_0001>

<bundles_post_ra>
// kernel: softsign_actor_forward.1
= control target key start
LH: loop header
LB: loop body
LE: loop exit
PB: predicated region body
PF: predicated region fallthrough
CT: control target
= control target key end

     0   :  { %v1764_v2 = vmov 0   ;;  %vm84_vm0 = vcmask 261120   ;;  %s2327_s0 = inlined_call_operand.vmem [shape: f32[8,32], index: 0, kind: input, shape index: {}]   ;;  %s2328_s1 = inlined_call_operand.vmem [shape: bf16[32,256], index: 1, kind: input, shape index: {}]   ;;  %s2329_s2 = inlined_call_operand.vmem [shape: f32[1,256], index: 2, kind: input, shape index: {}]   ;;  %s2330_s3 = inlined_call_operand.vmem [shape: bf16[256,256], index: 3, kind: input, shape index: {}]   ;;  %s2331_s4 = inlined_call_operand.vmem [shape: f32[1,256], index: 4, kind: input, shape index: {}]   ;;  %s2332_s5 = inlined_call_operand.vmem [shape: bf16[256,256], index: 5, kind: input, shape index: {}]   ;;  %s2333_s6 = inlined_call_operand.vmem [shape: f32[1,256], index: 6, kind: input, shape index: {}]   ;;  %s2334_s7 = inlined_call_operand.vmem [shape: bf16[256,256], index: 7, kind: input, shape index: {}]   ;;  %s2335_s8 = inlined_call_operand.vmem [shape: f32[1,256], index: 8, kind: input, shape index: {}]   ;;  %s2336_s9 = inlined_call_operand.vmem [shape: bf16[256,256], index: 9, kind: input, shape index: {}]   ;;  %s2337_s10 = inlined_call_operand.vmem [shape: f32[1,256], index: 10, kind: input, shape index: {}]   ;;  %s2338_s11 = inlined_call_operand.vmem [shape: bf16[256,128], index: 11, kind: input, shape index: {}]   ;;  %s2339_s12 = inlined_call_operand.vmem [shape: f32[1,128], index: 12, kind: input, shape index: {}]   ;;  %s2340_s13 = inlined_call_operand.hbm [shape: f32[8,128], index: 13, kind: output, shape index: {}]  }
   0x1   :  { %v1512_v0 = vld [vmem:[%s2328_s1 + $0x4] ss:$8 sps:$4 sm:$0xff]   ;;  %v1514_v1 = vld [vmem:[%s2328_s1] ss:$8 sps:$4 sm:$0xff]   ;;  %120 = vmatprep.mubr.bf16.mxu0 %v1764_v2  ;;  %v1515_v3 = vld [vmem:[%s2328_s1 + $0x14] ss:$8 sps:$4 sm:$0xff]  }
   0x2   :  { %88 = vmatprep.subr.bf16.mxu0 %v1512_v0  ;;  %v1517_v4 = vld [vmem:[%s2328_s1 + $0x10] ss:$8 sps:$4 sm:$0xff]   ;;  %v46_v5 = vld [vmem:[%s2327_s0] sm:$0xff]  ;;  %v1521_v8 = vld [vmem:[%s2330_s3 + $0x14] ss:$8 sps:$4 sm:$0xff]  }
   0x3   :  { %89 = vmatpush1.bf16.msra.mxu0 %v1514_v1  ;;  %v1518_v6 = vld [vmem:[%s2330_s3 + $0x4] ss:$8 sps:$4 sm:$0xff]   ;;  %v1520_v7 = vld [vmem:[%s2330_s3] ss:$8 sps:$4 sm:$0xff]   ;;  %v47_v9 = vpack.c.bf16 %v46_v5, %v46_v5  ;;  %v1523_v10 = vld [vmem:[%s2330_s3 + $0x10] ss:$8 sps:$4 sm:$0xff]  }
   0x4   :  { %90 = vmatprep.subr.bf16.mxu0 %v1515_v3  ;;  %343 = vmatprep.subr.bf16.mxu1 %v1518_v6  ;;  %v1524_v11 = vld [vmem:[%s2330_s3 + $0x24] ss:$8 sps:$4 sm:$0xff]   ;;  %v1526_v12 = vld [vmem:[%s2330_s3 + $0x20] ss:$8 sps:$4 sm:$0xff]   ;;  %v1527_v13 = vld [vmem:[%s2330_s3 + $0x34] ss:$8 sps:$4 sm:$0xff]  }
   0x5   :  { %344 = vmatpush1.bf16.msra.mxu1 %v1520_v7  ;;  %v1529_v14 = vld [vmem:[%s2330_s3 + $0x30] ss:$8 sps:$4 sm:$0xff]   ;;  %v1530_v15 = vld [vmem:[%s2330_s3 + $0x44] ss:$8 sps:$4 sm:$0xff]   ;;  %v1532_v16 = vld [vmem:[%s2330_s3 + $0x40] ss:$8 sps:$4 sm:$0xff]  }
   0x6   :  { %345 = vmatprep.subr.bf16.mxu1 %v1521_v8  ;;  %v1533_v17 = vld [vmem:[%s2330_s3 + $0x54] ss:$8 sps:$4 sm:$0xff]   ;;  %v1535_v18 = vld [vmem:[%s2330_s3 + $0x50] ss:$8 sps:$4 sm:$0xff]   ;;  %v1536_v19 = vld [vmem:[%s2330_s3 + $0x64] ss:$8 sps:$4 sm:$0xff]  }
   0x7   :  { %91 = vmatpush1.bf16.msra.mxu0 %v1517_v4  ;;  %v1538_v20 = vld [vmem:[%s2330_s3 + $0x60] ss:$8 sps:$4 sm:$0xff]   ;;  %v1539_v21 = vld [vmem:[%s2330_s3 + $0x74] ss:$8 sps:$4 sm:$0xff]   ;;  %v1541_v22 = vld [vmem:[%s2330_s3 + $0x70] ss:$8 sps:$4 sm:$0xff]  }
   0x8   :  { %v1542_v23 = vld [vmem:[%s2330_s3 + $0x84] ss:$8 sps:$4 sm:$0xff]   ;;  %v1544_v24 = vld [vmem:[%s2330_s3 + $0x80] ss:$8 sps:$4 sm:$0xff]   ;;  %v1545_v25 = vld [vmem:[%s2330_s3 + $0x94] ss:$8 sps:$4 sm:$0xff]  }
   0x9   :  { %346 = vmatpush1.bf16.msra.mxu1 %v1523_v10  ;;  %v1547_v26 = vld [vmem:[%s2330_s3 + $0x90] ss:$8 sps:$4 sm:$0xff]  }
   0xa   :  { %1342 = vmatmul.mubr.msk.bf16.vlgmr.msra.gmra.mrb[0].mxu0 %vm84_vm0, %v47_v9  ;;  %347 = vmatprep.subr.bf16.mxu1 %v1524_v11 }
   0xd   :  { %348 = vmatpush1.bf16.msra.mxu1 %v1526_v12 }
   0xe   :  { %349 = vmatprep.subr.bf16.mxu1 %v1527_v13 }
  0x11   :  { %350 = vmatpush1.bf16.msra.mxu1 %v1529_v14 }
  0x12   :  { %351 = vmatprep.subr.bf16.mxu1 %v1530_v15 }
  0x15   :  { %352 = vmatpush1.bf16.msra.mxu1 %v1532_v16 }
  0x16   :  { %353 = vmatprep.subr.bf16.mxu1 %v1533_v17 }
  0x19   :  { %354 = vmatpush1.bf16.msra.mxu1 %v1535_v18 }
  0x1a   :  { %355 = vmatprep.subr.bf16.mxu1 %v1536_v19 }
  0x1d   :  { %356 = vmatpush1.bf16.msra.mxu1 %v1538_v20 }
  0x1e   :  { %357 = vmatprep.subr.bf16.mxu1 %v1539_v21 }
  0x21   :  { %358 = vmatpush1.bf16.msra.mxu1 %v1541_v22 }
  0x22   :  { %359 = vmatprep.subr.bf16.mxu1 %v1542_v23 }
  0x25   :  { %360 = vmatpush1.bf16.msra.mxu1 %v1544_v24 }
  0x26   :  { %361 = vmatprep.subr.bf16.mxu1 %v1545_v25 }
  0x29   :  { %362 = vmatpush1.bf16.msra.mxu1 %v1547_v26 }
  0x2a   :  { %18 = vsyncpa [#allocation3], 0  ;;  %v1548_v27 = vld [vmem:[%s2330_s3 + $0xa4] ss:$8 sps:$4 sm:$0xff]   ;;  %v1550_v28 = vld [vmem:[%s2330_s3 + $0xa0] ss:$8 sps:$4 sm:$0xff]   ;;  %v54_v59 = vlaneseq }
  0x2b   :  { %363 = vmatprep.subr.bf16.mxu1 %v1548_v27  ;;  %v1551_v29 = vld [vmem:[%s2330_s3 + $0xb4] ss:$8 sps:$4 sm:$0xff]   ;;  %v1553_v30 = vld [vmem:[%s2330_s3 + $0xb0] ss:$8 sps:$4 sm:$0xff]   ;;  %v1554_v31 = vld [vmem:[%s2330_s3 + $0xc4] ss:$8 sps:$4 sm:$0xff]  }
  0x2c   :  { %v1556_v32 = vld [vmem:[%s2330_s3 + $0xc0] ss:$8 sps:$4 sm:$0xff]   ;;  %v1557_v33 = vld [vmem:[%s2330_s3 + $0xd4] ss:$8 sps:$4 sm:$0xff]   ;;  %v1559_v34 = vld [vmem:[%s2330_s3 + $0xd0] ss:$8 sps:$4 sm:$0xff]  }
  0x2d   :  { %364 = vmatpush1.bf16.msra.mxu1 %v1550_v28  ;;  %v1560_v35 = vld [vmem:[%s2330_s3 + $0xe4] ss:$8 sps:$4 sm:$0xff]   ;;  %v1562_v36 = vld [vmem:[%s2330_s3 + $0xe0] ss:$8 sps:$4 sm:$0xff]   ;;  %v1563_v37 = vld [vmem:[%s2330_s3 + $0xf4] ss:$8 sps:$4 sm:$0xff]  }
  0x2e   :  { %365 = vmatprep.subr.bf16.mxu1 %v1551_v29  ;;  %v1565_v38 = vld [vmem:[%s2330_s3 + $0xf0] ss:$8 sps:$4 sm:$0xff]   ;;  %v1566_v39 = vld [vmem:[%s2332_s5] ss:$8 sps:$4 sm:$0xff]   ;;  %v1568_v40 = vld [vmem:[%s2332_s5 + $0x4] ss:$8 sps:$4 sm:$0xff]  }
  0x2f   :  { %v1571_v41 = vld [vmem:[%s2332_s5 + $0x14] ss:$8 sps:$4 sm:$0xff]   ;;  %598 = vmatprep.subr.bf16.mxu0 %v1568_v40  ;;  %v1569_v42 = vld [vmem:[%s2332_s5 + $0x10] ss:$8 sps:$4 sm:$0xff]   ;;  %v1574_v43 = vld [vmem:[%s2332_s5 + $0x24] ss:$8 sps:$4 sm:$0xff]  }
  0x30   :  { %599 = vmatpush1.bf16.msra.mxu0 %v1566_v39  ;;  %v1572_v44 = vld [vmem:[%s2332_s5 + $0x20] ss:$8 sps:$4 sm:$0xff]   ;;  %v1577_v45 = vld [vmem:[%s2332_s5 + $0x34] ss:$8 sps:$4 sm:$0xff]   ;;  %v1575_v46 = vld [vmem:[%s2332_s5 + $0x30] ss:$8 sps:$4 sm:$0xff]  }
  0x31   :  { %366 = vmatpush1.bf16.msra.mxu1 %v1553_v30  ;;  %600 = vmatprep.subr.bf16.mxu0 %v1571_v41  ;;  %v1580_v47 = vld [vmem:[%s2332_s5 + $0x44] ss:$8 sps:$4 sm:$0xff]   ;;  %v1578_v48 = vld [vmem:[%s2332_s5 + $0x40] ss:$8 sps:$4 sm:$0xff]   ;;  %v1583_v49 = vld [vmem:[%s2332_s5 + $0x54] ss:$8 sps:$4 sm:$0xff]  }
  0x32   :  { %367 = vmatprep.subr.bf16.mxu1 %v1554_v31  ;;  %v1581_v50 = vld [vmem:[%s2332_s5 + $0x50] ss:$8 sps:$4 sm:$0xff]   ;;  %v1586_v51 = vld [vmem:[%s2332_s5 + $0x64] ss:$8 sps:$4 sm:$0xff]   ;;  %v1584_v52 = vld [vmem:[%s2332_s5 + $0x60] ss:$8 sps:$4 sm:$0xff]  }
  0x33   :  { %v1589_v53 = vld [vmem:[%s2332_s5 + $0x74] ss:$8 sps:$4 sm:$0xff]   ;;  %v1587_v54 = vld [vmem:[%s2332_s5 + $0x70] ss:$8 sps:$4 sm:$0xff]   ;;  %v1592_v55 = vld [vmem:[%s2332_s5 + $0x84] ss:$8 sps:$4 sm:$0xff]  }
  0x34   :  { %601 = vmatpush1.bf16.msra.mxu0 %v1569_v42  ;;  %v1590_v56 = vld [vmem:[%s2332_s5 + $0x80] ss:$8 sps:$4 sm:$0xff]   ;;  %v1595_v57 = vld [vmem:[%s2332_s5 + $0x94] ss:$8 sps:$4 sm:$0xff]   ;;  %v1593_v58 = vld [vmem:[%s2332_s5 + $0x90] ss:$8 sps:$4 sm:$0xff]  }
  0x35   :  { %368 = vmatpush1.bf16.msra.mxu1 %v1556_v32  ;;  %602 = vmatprep.subr.bf16.mxu0 %v1574_v43  ;;  %v55_v60 = vshrl.u32 %v54_v59, 7  ;;  %v52_v62 = vld [vmem:[%s2329_s2] sm:$0x3]  ;;  %v1598_v18 = vld [vmem:[%s2332_s5 + $0xa4] ss:$8 sps:$4 sm:$0xff]  }
  0x36   :  { %369 = vmatprep.subr.bf16.mxu1 %v1557_v33  ;;  %v1596_v19 = vld [vmem:[%s2332_s5 + $0xa0] ss:$8 sps:$4 sm:$0xff]   ;;  %v1601_v20 = vld [vmem:[%s2332_s5 + $0xb4] ss:$8 sps:$4 sm:$0xff]   ;;  %v1599_v21 = vld [vmem:[%s2332_s5 + $0xb0] ss:$8 sps:$4 sm:$0xff]  }
  0x37   :  { %v2007_v61 = vsub.s32 0, %v55_v60  ;;  %v2012_v63 = vsub.s32 1, %v55_v60  ;;  %v1604_v22 = vld [vmem:[%s2332_s5 + $0xc4] ss:$8 sps:$4 sm:$0xff]   ;;  %v1602_v23 = vld [vmem:[%s2332_s5 + $0xc0] ss:$8 sps:$4 sm:$0xff]  }
  0x38   :  { %603 = vmatpush1.bf16.msra.mxu0 %v1572_v44  ;;  %v1607_v24 = vld [vmem:[%s2332_s5 + $0xd4] ss:$8 sps:$4 sm:$0xff]   ;;  %v1605_v25 = vld [vmem:[%s2332_s5 + $0xd0] ss:$8 sps:$4 sm:$0xff]   ;;  %v1610_v26 = vld [vmem:[%s2332_s5 + $0xe4] ss:$8 sps:$4 sm:$0xff]  }
  0x39   :  { %370 = vmatpush1.bf16.msra.mxu1 %v1559_v34  ;;  %604 = vmatprep.subr.bf16.mxu0 %v1577_v45  ;;  %v57_v0 = vrot.slane %v52_v62, %v2007_v61  ;;  %v61_v1 = vrot.slane %v52_v62, %v2012_v63  ;;  %v1608_v27 = vld [vmem:[%s2332_s5 + $0xe0] ss:$8 sps:$4 sm:$0xff]   ;;  %v1613_v28 = vld [vmem:[%s2332_s5 + $0xf4] ss:$8 sps:$4 sm:$0xff]   ;;  %v1611_v29 = vld [vmem:[%s2332_s5 + $0xf0] ss:$8 sps:$4 sm:$0xff]  }
  0x3a   :  { %371 = vmatprep.subr.bf16.mxu1 %v1560_v35  ;;  %v1614_v30 = vld [vmem:[%s2334_s7] ss:$8 sps:$4 sm:$0xff]   ;;  %v1616_v31 = vld [vmem:[%s2334_s7 + $0x4] ss:$8 sps:$4 sm:$0xff]   ;;  %v1619_v32 = vld [vmem:[%s2334_s7 + $0x14] ss:$8 sps:$4 sm:$0xff]  }
  0x3b   :  { %v1617_v33 = vld [vmem:[%s2334_s7 + $0x10] ss:$8 sps:$4 sm:$0xff]   ;;  %v1622_v34 = vld [vmem:[%s2334_s7 + $0x24] ss:$8 sps:$4 sm:$0xff]   ;;  %v1620_v35 = vld [vmem:[%s2334_s7 + $0x20] ss:$8 sps:$4 sm:$0xff]  }
  0x3c   :  { %605 = vmatpush1.bf16.msra.mxu0 %v1575_v46  ;;  %v1626_v39 = vld [vmem:[%s2334_s7 + $0x40] ss:$8 sps:$4 sm:$0xff]   ;;  %v1631_v40 = vld [vmem:[%s2334_s7 + $0x54] ss:$8 sps:$4 sm:$0xff]   ;;  %v1629_v41 = vld [vmem:[%s2334_s7 + $0x50] ss:$8 sps:$4 sm:$0xff]  }
  0x3d   :  { %372 = vmatpush1.bf16.msra.mxu1 %v1562_v36  ;;  %606 = vmatprep.subr.bf16.mxu0 %v1580_v47  ;;  %v1625_v36 = vld [vmem:[%s2334_s7 + $0x34] ss:$8 sps:$4 sm:$0xff]   ;;  %v1634_v42 = vld [vmem:[%s2334_s7 + $0x64] ss:$8 sps:$4 sm:$0xff]   ;;  %v1632_v43 = vld [vmem:[%s2334_s7 + $0x60] ss:$8 sps:$4 sm:$0xff]  }
  0x3e   :  { %373 = vmatprep.subr.bf16.mxu1 %v1563_v37  ;;  %v1623_v37 = vld [vmem:[%s2334_s7 + $0x30] ss:$8 sps:$4 sm:$0xff]   ;;  %v1637_v44 = vld [vmem:[%s2334_s7 + $0x74] ss:$8 sps:$4 sm:$0xff]   ;;  %v1640_v46 = vld [vmem:[%s2334_s7 + $0x84] ss:$8 sps:$4 sm:$0xff]  }
  0x3f   :  { %v1635_v45 = vld [vmem:[%s2334_s7 + $0x70] ss:$8 sps:$4 sm:$0xff]   ;;  %v1638_v47 = vld [vmem:[%s2334_s7 + $0x80] ss:$8 sps:$4 sm:$0xff]  }
  0x40   :  { %607 = vmatpush1.bf16.msra.mxu0 %v1578_v48  ;;  %v1643_v48 = vld [vmem:[%s2334_s7 + $0x94] ss:$8 sps:$4 sm:$0xff]  }
  0x41   :  { %374 = vmatpush1.bf16.msra.mxu1 %v1565_v38  ;;  %608 = vmatprep.subr.bf16.mxu0 %v1583_v49  ;;  %v1628_v38 = vld [vmem:[%s2334_s7 + $0x44] ss:$8 sps:$4 sm:$0xff]   ;;  %v1641_v49 = vld [vmem:[%s2334_s7 + $0x90] ss:$8 sps:$4 sm:$0xff]  }
  0x42   :  { %853 = vmatprep.subr.bf16.mxu1 %v1616_v31  ;;  %v1682_v31 = vld [vmem:[%s2336_s9 + $0x64] ss:$8 sps:$4 sm:$0xff]  }
  0x44   :  { %609 = vmatpush1.bf16.msra.mxu0 %v1581_v50  ;;  %v171_v50 = vld [vmem:[%s2331_s4] sm:$0x3] }
  0x45   :  { %610 = vmatprep.subr.bf16.mxu0 %v1586_v51  ;;  %v176_v51 = vrot.slane %v171_v50, %v2007_v61 }
  0x48   :  { %611 = vmatpush1.bf16.msra.mxu0 %v1584_v52  ;;  %v180_v52 = vrot.slane %v171_v50, %v2012_v63 }
  0x49   :  { %612 = vmatprep.subr.bf16.mxu0 %v1589_v53 }
  0x4c   :  { %613 = vmatpush1.bf16.msra.mxu0 %v1587_v54 }
  0x4d   :  { %614 = vmatprep.subr.bf16.mxu0 %v1592_v55 }
  0x50   :  { %615 = vmatpush1.bf16.msra.mxu0 %v1590_v56 }
  0x51   :  { %616 = vmatprep.subr.bf16.mxu0 %v1595_v57 }
  0x54   :  { %617 = vmatpush1.bf16.msra.mxu0 %v1593_v58 }
  0x55   :  { %618 = vmatprep.subr.bf16.mxu0 %v1598_v18  ;;  %v1659_v18 = vld [vmem:[%s2334_s7 + $0xf0] ss:$8 sps:$4 sm:$0xff]  }
  0x58   :  { %619 = vmatpush1.bf16.msra.mxu0 %v1596_v19  ;;  %v1662_v19 = vld [vmem:[%s2336_s9] ss:$8 sps:$4 sm:$0xff]  }
  0x59   :  { %620 = vmatprep.subr.bf16.mxu0 %v1601_v20  ;;  %v1664_v20 = vld [vmem:[%s2336_s9 + $0x4] ss:$8 sps:$4 sm:$0xff]  }
  0x5c   :  { %621 = vmatpush1.bf16.msra.mxu0 %v1599_v21  ;;  %v1667_v21 = vld [vmem:[%s2336_s9 + $0x14] ss:$8 sps:$4 sm:$0xff]  }
  0x5d   :  { %622 = vmatprep.subr.bf16.mxu0 %v1604_v22  ;;  %v1665_v22 = vld [vmem:[%s2336_s9 + $0x10] ss:$8 sps:$4 sm:$0xff]  }
  0x60   :  { %623 = vmatpush1.bf16.msra.mxu0 %v1602_v23  ;;  %v1670_v23 = vld [vmem:[%s2336_s9 + $0x24] ss:$8 sps:$4 sm:$0xff]  }
  0x61   :  { %624 = vmatprep.subr.bf16.mxu0 %v1607_v24  ;;  %v1668_v24 = vld [vmem:[%s2336_s9 + $0x20] ss:$8 sps:$4 sm:$0xff]  }
  0x64   :  { %625 = vmatpush1.bf16.msra.mxu0 %v1605_v25  ;;  %v1673_v25 = vld [vmem:[%s2336_s9 + $0x34] ss:$8 sps:$4 sm:$0xff]  }
  0x65   :  { %626 = vmatprep.subr.bf16.mxu0 %v1610_v26  ;;  %v1671_v26 = vld [vmem:[%s2336_s9 + $0x30] ss:$8 sps:$4 sm:$0xff]  }
  0x68   :  { %627 = vmatpush1.bf16.msra.mxu0 %v1608_v27  ;;  %v1676_v27 = vld [vmem:[%s2336_s9 + $0x44] ss:$8 sps:$4 sm:$0xff]  }
  0x69   :  { %628 = vmatprep.subr.bf16.mxu0 %v1613_v28  ;;  %v1674_v28 = vld [vmem:[%s2336_s9 + $0x40] ss:$8 sps:$4 sm:$0xff]  }
  0x6c   :  { %629 = vmatpush1.bf16.msra.mxu0 %v1611_v29  ;;  %v1679_v29 = vld [vmem:[%s2336_s9 + $0x54] ss:$8 sps:$4 sm:$0xff]  }
  0x6d   :  { %1102 = vmatprep.subr.bf16.mxu0 %v1664_v20  ;;  %v681_v20 = vld [vmem:[%s2335_s8] sm:$0x3] }
  0xdd   :  { %v122_v2 = vpop.f32.mrb[0].mxu0 }
  0xde   :  { %v123_v3 = vadd.f32 %v122_v2, %v57_v0  ;;  %v124_v4 = vpop.f32.mrb[1].mxu0 }
  0xdf   :  { %v125_v5 = vadd.f32 %v124_v4, %v61_v1  ;;  %v126_v6 = vpop.f32.mrb[2].mxu0 }
  0xe0   :  { %v129_v7 = vand.u32 2147483647, %v123_v3  ;;  %v127_v8 = vpop.f32.mrb[3].mxu0 }
  0xe1   :  { %v130_v9 = vand.u32 2147483647, %v125_v5  ;;  %v1644_v8 = vld [vmem:[%s2334_s7 + $0xa0] ss:$8 sps:$4 sm:$0xff]  }
  0xe2   :  { %v131_v10 = vadd.f32 1.0, %v129_v7  ;;  %v1646_v7 = vld [vmem:[%s2334_s7 + $0xa4] ss:$8 sps:$4 sm:$0xff]  }
  0xe3   :  { %v132_v11 = vadd.f32 1.0, %v130_v9  ;;  %v1649_v9 = vld [vmem:[%s2334_s7 + $0xb4] ss:$8 sps:$4 sm:$0xff]  }
  0xe4   :  { %1726 = vrcp.f32 %v131_v10  ;;  %v1647_v10 = vld [vmem:[%s2334_s7 + $0xb0] ss:$8 sps:$4 sm:$0xff]  }
  0xe5   :  { %1728 = vrcp.f32 %v132_v11  ;;  %v1652_v11 = vld [vmem:[%s2334_s7 + $0xc4] ss:$8 sps:$4 sm:$0xff]  }
  0xee   :  { %v1727_v12 = vpop.eup %1726 }
  0xef   :  { %v1729_v13 = vpop.eup %1728  ;;  %v135_v14 = vmul.f32 %v1727_v12, %v123_v3  ;;  %v1650_v12 = vld [vmem:[%s2334_s7 + $0xc0] ss:$8 sps:$4 sm:$0xff]  }
  0xf0   :  { %v136_v15 = vmul.f32 %v1729_v13, %v125_v5  ;;  %v1655_v13 = vld [vmem:[%s2334_s7 + $0xd4] ss:$8 sps:$4 sm:$0xff]  }
  0xf1   :  { %v137_v17 = vpack.c.bf16 %v135_v14, %v135_v14  ;;  %v1653_v14 = vld [vmem:[%s2334_s7 + $0xd0] ss:$8 sps:$4 sm:$0xff]  }
  0xf2   :  { %v138_v16 = vpack.c.bf16 %v136_v15, %v136_v15  ;;  %v1658_v15 = vld [vmem:[%s2334_s7 + $0xe4] ss:$8 sps:$4 sm:$0xff]  }
  0xf4   :  { %375 = vmatprep.mubr.bf16.mxu1 %v138_v16  ;;  %v1656_v16 = vld [vmem:[%s2334_s7 + $0xe0] ss:$8 sps:$4 sm:$0xff]  }
  0xf5   :  { %376 = vmatmul.mubr.bf16.vlgmr.msra.gmra.mrb[0].mxu1 %v137_v17  ;;  %v1661_v17 = vld [vmem:[%s2334_s7 + $0xf4] ss:$8 sps:$4 sm:$0xff]  }
  0xf6   :  { %854 = vmatpush1.bf16.msra.mxu1 %v1614_v30  ;;  %v1677_v30 = vld [vmem:[%s2336_s9 + $0x50] ss:$8 sps:$4 sm:$0xff]  }
  0xf7   :  { %855 = vmatprep.subr.bf16.mxu1 %v1619_v32  ;;  %v1680_v32 = vld [vmem:[%s2336_s9 + $0x60] ss:$8 sps:$4 sm:$0xff]  }
  0xfa   :  { %856 = vmatpush1.bf16.msra.mxu1 %v1617_v33  ;;  %v1685_v33 = vld [vmem:[%s2336_s9 + $0x74] ss:$8 sps:$4 sm:$0xff]  }
  0xfb   :  { %857 = vmatprep.subr.bf16.mxu1 %v1622_v34  ;;  %v1683_v34 = vld [vmem:[%s2336_s9 + $0x70] ss:$8 sps:$4 sm:$0xff]  }
  0xfe   :  { %858 = vmatpush1.bf16.msra.mxu1 %v1620_v35  ;;  %v1688_v35 = vld [vmem:[%s2336_s9 + $0x84] ss:$8 sps:$4 sm:$0xff]  }
  0xff   :  { %859 = vmatprep.subr.bf16.mxu1 %v1625_v36  ;;  %v1686_v36 = vld [vmem:[%s2336_s9 + $0x80] ss:$8 sps:$4 sm:$0xff]  }
 0x102   :  { %860 = vmatpush1.bf16.msra.mxu1 %v1623_v37  ;;  %v1691_v37 = vld [vmem:[%s2336_s9 + $0x94] ss:$8 sps:$4 sm:$0xff]  }
 0x103   :  { %861 = vmatprep.subr.bf16.mxu1 %v1628_v38  ;;  %v1689_v38 = vld [vmem:[%s2336_s9 + $0x90] ss:$8 sps:$4 sm:$0xff]  }
 0x106   :  { %862 = vmatpush1.bf16.msra.mxu1 %v1626_v39  ;;  %v1694_v39 = vld [vmem:[%s2336_s9 + $0xa4] ss:$8 sps:$4 sm:$0xff]  }
 0x107   :  { %863 = vmatprep.subr.bf16.mxu1 %v1631_v40  ;;  %v1692_v40 = vld [vmem:[%s2336_s9 + $0xa0] ss:$8 sps:$4 sm:$0xff]  }
 0x10a   :  { %864 = vmatpush1.bf16.msra.mxu1 %v1629_v41  ;;  %v1697_v41 = vld [vmem:[%s2336_s9 + $0xb4] ss:$8 sps:$4 sm:$0xff]  }
 0x10b   :  { %865 = vmatprep.subr.bf16.mxu1 %v1634_v42  ;;  %v1695_v42 = vld [vmem:[%s2336_s9 + $0xb0] ss:$8 sps:$4 sm:$0xff]  }
 0x10e   :  { %866 = vmatpush1.bf16.msra.mxu1 %v1632_v43  ;;  %v1700_v43 = vld [vmem:[%s2336_s9 + $0xc4] ss:$8 sps:$4 sm:$0xff]  }
 0x10f   :  { %867 = vmatprep.subr.bf16.mxu1 %v1637_v44  ;;  %v1698_v44 = vld [vmem:[%s2336_s9 + $0xc0] ss:$8 sps:$4 sm:$0xff]  }
 0x112   :  { %868 = vmatpush1.bf16.msra.mxu1 %v1635_v45  ;;  %v1703_v45 = vld [vmem:[%s2336_s9 + $0xd4] ss:$8 sps:$4 sm:$0xff]  }
 0x113   :  { %869 = vmatprep.subr.bf16.mxu1 %v1640_v46  ;;  %v1701_v46 = vld [vmem:[%s2336_s9 + $0xd0] ss:$8 sps:$4 sm:$0xff]  }
 0x116   :  { %870 = vmatpush1.bf16.msra.mxu1 %v1638_v47  ;;  %v426_v47 = vld [vmem:[%s2333_s6] sm:$0x3] }
 0x117   :  { %871 = vmatprep.subr.bf16.mxu1 %v1643_v48  ;;  %v431_v48 = vrot.slane %v426_v47, %v2007_v61 }
 0x11a   :  { %872 = vmatpush1.bf16.msra.mxu1 %v1641_v49  ;;  %v435_v49 = vrot.slane %v426_v47, %v2012_v63 }
 0x11b   :  { %873 = vmatprep.subr.bf16.mxu1 %v1646_v7  ;;  %v1707_v7 = vld [vmem:[%s2336_s9 + $0xf0] ss:$8 sps:$4 sm:$0xff]  }
 0x11e   :  { %874 = vmatpush1.bf16.msra.mxu1 %v1644_v8  ;;  %v1710_v8 = vld [vmem:[%s2338_s11 + $0x40] sm:$0xff]  }
 0x11f   :  { %875 = vmatprep.subr.bf16.mxu1 %v1649_v9  ;;  %v1711_v9 = vld [vmem:[%s2338_s11] sm:$0xff]  }
 0x122   :  { %876 = vmatpush1.bf16.msra.mxu1 %v1647_v10  ;;  %v1712_v10 = vld [vmem:[%s2338_s11 + $0x48] sm:$0xff]  }
 0x123   :  { %877 = vmatprep.subr.bf16.mxu1 %v1652_v11  ;;  %v1713_v11 = vld [vmem:[%s2338_s11 + $0x8] sm:$0xff]  }
 0x126   :  { %878 = vmatpush1.bf16.msra.mxu1 %v1650_v12  ;;  %v1714_v12 = vld [vmem:[%s2338_s11 + $0x50] sm:$0xff]  }
 0x127   :  { %879 = vmatprep.subr.bf16.mxu1 %v1655_v13  ;;  %v1715_v13 = vld [vmem:[%s2338_s11 + $0x10] sm:$0xff]  }
 0x12a   :  { %880 = vmatpush1.bf16.msra.mxu1 %v1653_v14  ;;  %v1716_v14 = vld [vmem:[%s2338_s11 + $0x58] sm:$0xff]  }
 0x12b   :  { %881 = vmatprep.subr.bf16.mxu1 %v1658_v15  ;;  %v1717_v15 = vld [vmem:[%s2338_s11 + $0x18] sm:$0xff]  }
 0x12e   :  { %882 = vmatpush1.bf16.msra.mxu1 %v1656_v16  ;;  %v1718_v16 = vld [vmem:[%s2338_s11 + $0x60] sm:$0xff]  }
 0x12f   :  { %883 = vmatprep.subr.bf16.mxu1 %v1661_v17  ;;  %v1719_v17 = vld [vmem:[%s2338_s11 + $0x20] sm:$0xff]  }
 0x132   :  { %884 = vmatpush1.bf16.msra.mxu1 %v1659_v18  ;;  %v1720_v18 = vld [vmem:[%s2338_s11 + $0x68] sm:$0xff]  }
 0x133   :  { %1488 = vmatprep.subr.bf16.mxu1 %v1710_v8 }
 0x1c8   :  { %v377_v53 = vpop.f32.mrb[0].mxu1 }
 0x1c9   :  { %v378_v54 = vadd.f32 %v377_v53, %v176_v51  ;;  %v379_v55 = vpop.f32.mrb[1].mxu1 }
 0x1ca   :  { %v380_v56 = vadd.f32 %v379_v55, %v180_v52  ;;  %v381_v57 = vpop.f32.mrb[2].mxu1 }
 0x1cb   :  { %v384_v58 = vand.u32 2147483647, %v378_v54  ;;  %v382_v59 = vpop.f32.mrb[3].mxu1 }
 0x1cc   :  { %v385_v60 = vand.u32 2147483647, %v380_v56 }
 0x1cd   :  { %v386_v62 = vadd.f32 1.0, %v384_v58 }
 0x1ce   :  { %v387_v0 = vadd.f32 1.0, %v385_v60 }
 0x1cf   :  { %1730 = vrcp.f32 %v386_v62 }
 0x1d0   :  { %1732 = vrcp.f32 %v387_v0 }
 0x1d9   :  { %v1731_v1 = vpop.eup %1730 }
 0x1da   :  { %v1733_v2 = vpop.eup %1732  ;;  %v390_v3 = vmul.f32 %v1731_v1, %v378_v54 }
 0x1db   :  { %v391_v4 = vmul.f32 %v1733_v2, %v380_v56 }
 0x1dc   :  { %v392_v6 = vpack.c.bf16 %v390_v3, %v390_v3 }
 0x1dd   :  { %v393_v5 = vpack.c.bf16 %v391_v4, %v391_v4  ;;  %v1706_v4 = vld [vmem:[%s2336_s9 + $0xe4] ss:$8 sps:$4 sm:$0xff]  }
 0x1df   :  { %630 = vmatprep.mubr.bf16.mxu0 %v393_v5  ;;  %v1704_v5 = vld [vmem:[%s2336_s9 + $0xe0] ss:$8 sps:$4 sm:$0xff]  }
 0x1e0   :  { %631 = vmatmul.mubr.bf16.vlgmr.msra.gmra.mrb[4].mxu0 %v392_v6  ;;  %v1709_v6 = vld [vmem:[%s2336_s9 + $0xf4] ss:$8 sps:$4 sm:$0xff]  }
 0x1e1   :  { %1103 = vmatpush1.bf16.msra.mxu0 %v1662_v19  ;;  %v1721_v19 = vld [vmem:[%s2338_s11 + $0x28] sm:$0xff]  }
 0x1e2   :  { %1104 = vmatprep.subr.bf16.mxu0 %v1667_v21  ;;  %v686_v21 = vrot.slane %v681_v20, %v2007_v61 }
 0x1e5   :  { %1105 = vmatpush1.bf16.msra.mxu0 %v1665_v22  ;;  %v690_v22 = vrot.slane %v681_v20, %v2012_v63 }
 0x1e6   :  { %1106 = vmatprep.subr.bf16.mxu0 %v1670_v23 }
 0x1e9   :  { %1107 = vmatpush1.bf16.msra.mxu0 %v1668_v24 }
 0x1ea   :  { %1108 = vmatprep.subr.bf16.mxu0 %v1673_v25 }
 0x1ed   :  { %1109 = vmatpush1.bf16.msra.mxu0 %v1671_v26 }
 0x1ee   :  { %1110 = vmatprep.subr.bf16.mxu0 %v1676_v27 }
 0x1f1   :  { %1111 = vmatpush1.bf16.msra.mxu0 %v1674_v28 }
 0x1f2   :  { %1112 = vmatprep.subr.bf16.mxu0 %v1679_v29 }
 0x1f5   :  { %1113 = vmatpush1.bf16.msra.mxu0 %v1677_v30 }
 0x1f6   :  { %1114 = vmatprep.subr.bf16.mxu0 %v1682_v31 }
 0x1f9   :  { %1115 = vmatpush1.bf16.msra.mxu0 %v1680_v32 }
 0x1fa   :  { %1116 = vmatprep.subr.bf16.mxu0 %v1685_v33  ;;  %v1722_v33 = vld [vmem:[%s2338_s11 + $0x70] sm:$0xff]  }
 0x1fd   :  { %1117 = vmatpush1.bf16.msra.mxu0 %v1683_v34  ;;  %v1723_v34 = vld [vmem:[%s2338_s11 + $0x30] sm:$0xff]  }
 0x1fe   :  { %1118 = vmatprep.subr.bf16.mxu0 %v1688_v35  ;;  %v1724_v35 = vld [vmem:[%s2338_s11 + $0x78] sm:$0xff]  }
 0x201   :  { %1119 = vmatpush1.bf16.msra.mxu0 %v1686_v36  ;;  %v1725_v36 = vld [vmem:[%s2338_s11 + $0x38] sm:$0xff]  }
 0x202   :  { %1120 = vmatprep.subr.bf16.mxu0 %v1691_v37  ;;  %v930_v37 = vld [vmem:[%s2337_s10] sm:$0x3]  ;;  %s1765_s10 = smov [#allocation2]  }
 0x203   :  { %s1330_s27 = sshll.u32 %s1765_s10, 4  ;;  %s1331_s27 = int_to_ptr.vmem [resolvable:$true] %s1330_s27 }
 0x204   :  { %s1740_s28 = scalar_lea.vmem %s1331_s27, 128  ;;  %p1745_p1 = scmp.lt.s32.totalorder %s1331_s27, %s1331_s27 }
 0x205   :  { %1121 = vmatpush1.bf16.msra.mxu0 %v1689_v38  ;;  %v935_v38 = vrot.slane %v930_v37, %v2007_v61  ;;  %p1741_p0 = scmp.ne.s32.totalorder %s1331_s27, %s1740_s28  ;;  %p1746_p2 = scmp.lt.s32.totalorder %s1740_s28, %s1740_s28 }
 0x206   :  { %1122 = vmatprep.subr.bf16.mxu0 %v1694_v39  ;;  %v939_v39 = vrot.slane %v930_v37, %v2012_v63 }
 0x207   :  { %p1747_p3 = por %p1746_p2, %p1745_p1 }
 0x209   :  { %1123 = vmatpush1.bf16.msra.mxu0 %v1692_v40  ;;  %p1748_p4 = pnand %p1747_p3, %p1741_p0 }
 0x20a   :  { %1124 = vmatprep.subr.bf16.mxu0 %v1697_v41 }
 0x20d   :  { %1125 = vmatpush1.bf16.msra.mxu0 %v1695_v42 }
 0x20e   :  { %1126 = vmatprep.subr.bf16.mxu0 %v1700_v43 }
 0x211   :  { %1127 = vmatpush1.bf16.msra.mxu0 %v1698_v44 }
 0x212   :  { %1128 = vmatprep.subr.bf16.mxu0 %v1703_v45 }
 0x215   :  { %1129 = vmatpush1.bf16.msra.mxu0 %v1701_v46 }
 0x216   :  { %1130 = vmatprep.subr.bf16.mxu0 %v1706_v4 }
 0x219   :  { %1131 = vmatpush1.bf16.msra.mxu0 %v1704_v5 }
 0x21a   :  { %1132 = vmatprep.subr.bf16.mxu0 %v1709_v6 }
 0x21d   :  { %1133 = vmatpush1.bf16.msra.mxu0 %v1707_v7 }
 0x2b3   :  { %v632_v50 = vpop.f32.mrb[4].mxu0 }
 0x2b4   :  { %v633_v51 = vadd.f32 %v632_v50, %v431_v48  ;;  %v634_v52 = vpop.f32.mrb[5].mxu0 }
 0x2b5   :  { %v635_v53 = vadd.f32 %v634_v52, %v435_v49  ;;  %v636_v54 = vpop.f32.mrb[6].mxu0 }
 0x2b6   :  { %v639_v55 = vand.u32 2147483647, %v633_v51  ;;  %v637_v56 = vpop.f32.mrb[7].mxu0 }
 0x2b7   :  { %v640_v57 = vand.u32 2147483647, %v635_v53 }
 0x2b8   :  { %v641_v58 = vadd.f32 1.0, %v639_v55 }
 0x2b9   :  { %v642_v59 = vadd.f32 1.0, %v640_v57 }
 0x2ba   :  { %1734 = vrcp.f32 %v641_v58 }
 0x2bb   :  { %1736 = vrcp.f32 %v642_v59 }
 0x2c4   :  { %v1735_v60 = vpop.eup %1734 }
 0x2c5   :  { %v1737_v62 = vpop.eup %1736  ;;  %v645_v0 = vmul.f32 %v1735_v60, %v633_v51  ;;  %v1471_v51 = vld [vmem:[%s2339_s12] ss:$0 sm:$0xff] }
 0x2c6   :  { %v646_v1 = vmul.f32 %v1737_v62, %v635_v53 }
 0x2c7   :  { %v647_v3 = vpack.c.bf16 %v645_v0, %v645_v0 }
 0x2c8   :  { %v648_v2 = vpack.c.bf16 %v646_v1, %v646_v1 }
 0x2ca   :  { %885 = vmatprep.mubr.bf16.mxu1 %v648_v2 }
 0x2cb   :  { %886 = vmatmul.mubr.bf16.vlgmr.msra.gmra.mrb[4].mxu1 %v647_v3 }
 0x2cc   :  { %1489 = vmatpush3.bf16.msra.mxu1 %v1711_v9 }
 0x2cd   :  { %1490 = vmatprep.subr.bf16.mxu1 %v1712_v10 }
 0x2d0   :  { %1491 = vmatpush3.bf16.msra.mxu1 %v1713_v11 }
 0x2d1   :  { %1492 = vmatprep.subr.bf16.mxu1 %v1714_v12 }
 0x2d4   :  { %1493 = vmatpush3.bf16.msra.mxu1 %v1715_v13 }
 0x2d5   :  { %1494 = vmatprep.subr.bf16.mxu1 %v1716_v14 }
 0x2d8   :  { %1495 = vmatpush3.bf16.msra.mxu1 %v1717_v15 }
 0x2d9   :  { %1496 = vmatprep.subr.bf16.mxu1 %v1718_v16 }
 0x2dc   :  { %1497 = vmatpush3.bf16.msra.mxu1 %v1719_v17 }
 0x2dd   :  { %1498 = vmatprep.subr.bf16.mxu1 %v1720_v18 }
 0x2e0   :  { %1499 = vmatpush3.bf16.msra.mxu1 %v1721_v19 }
 0x2e1   :  { %1500 = vmatprep.subr.bf16.mxu1 %v1722_v33 }
 0x2e4   :  { %1501 = vmatpush3.bf16.msra.mxu1 %v1723_v34 }
 0x2e5   :  { %1502 = vmatprep.subr.bf16.mxu1 %v1724_v35 }
 0x2e8   :  { %1503 = vmatpush3.bf16.msra.mxu1 %v1725_v36 }
 0x39e   :  { %v887_v23 = vpop.f32.mrb[4].mxu1 }
 0x39f   :  { %v888_v24 = vadd.f32 %v887_v23, %v686_v21  ;;  %v889_v25 = vpop.f32.mrb[5].mxu1 }
 0x3a0   :  { %v890_v26 = vadd.f32 %v889_v25, %v690_v22  ;;  %v891_v27 = vpop.f32.mrb[6].mxu1 }
 0x3a1   :  { %v894_v28 = vmax.f32 %v888_v24, 0.0  ;;  %v892_v29 = vpop.f32.mrb[7].mxu1 }
 0x3a2   :  { %v895_v30 = vmax.f32 %v890_v26, 0.0 }
 0x3a3   :  { %v896_v32 = vpack.c.bf16 %v894_v28, %v894_v28 }
 0x3a4   :  { %v897_v31 = vpack.c.bf16 %v895_v30, %v895_v30 }
 0x3a6   :  { %1134 = vmatprep.mubr.bf16.mxu0 %v897_v31 }
 0x3a7   :  { %1135 = vmatmul.mubr.bf16.vlgmr.msra.gmra.mrb[8].mxu0 %v896_v32 }
 0x47a   :  { %v1136_v40 = vpop.f32.mrb[8].mxu0 }
 0x47b   :  { %v1137_v41 = vadd.f32 %v1136_v40, %v935_v38  ;;  %v1138_v42 = vpop.f32.mrb[9].mxu0 }
 0x47c   :  { %v1139_v43 = vadd.f32 %v1138_v42, %v939_v39  ;;  %v1140_v44 = vpop.f32.mrb[10].mxu0 }
 0x47d   :  { %v1143_v45 = vmax.f32 %v1137_v41, 0.0  ;;  %v1141_v46 = vpop.f32.mrb[11].mxu0 }
 0x47e   :  { %v1144_v47 = vmax.f32 %v1139_v43, 0.0 }
 0x47f   :  { %v1145_v49 = vpack.c.bf16 %v1143_v45, %v1143_v45 }
 0x480   :  { %v1146_v48 = vpack.c.bf16 %v1144_v47, %v1144_v47 }
 0x482   :  { %1314 = vmatprep.mubr.bf16.mxu1 %v1146_v48 }
 0x483   :  { %1315 = vmatmul.mubr.bf16.vlgmr.msra.gmra.mrb[8].mxu1 %v1145_v49 }
 0x556   :  { %v1504_v50 = vpop.f32.mrb[8].mxu1 }
 0x557   :  { %v1505_v61 = vpop.f32.mrb[9].mxu1 }
 0x558   :  { %v1506_v52 = vadd.f32 %v1505_v61, %v1504_v50  ;;  %v1507_v63 = vpop.f32.mrb[10].mxu1 }
 0x559   :  { %v1508_v53 = vpop.f32.mrb[11].mxu1 }
 0x55a   :  { %v1317_v54 = vadd.f32 %v1506_v52, %v1471_v51 }
 0x55c   :  { %1738 = vtanh.f32 %v1317_v54 }
 0x566   :  { %v1739_v55 = vpop.eup %1738 }
 0x567   :  { %1323 = vst [vmem:[#allocation2] sm:$0xff] %v1739_v55 }
 0x568   :  { %1751 = shalt.err (!%p1748_p4)
}
 0x569   :  { %s1752_s30 = scalar_lea.hbm %s2340_s13, 128 }
 0x56a   :  { %p1753_p5 = scmp.ne.s32.totalorder %s2340_s13, %s1752_s30  ;;  %p1756_p6 = scmp.lt.u32.totalorder %s1752_s30, %s2340_s13 }
 0x56c   :  { %p1758_p7 = pnand %p1756_p6, %p1753_p5 }
 0x56e   :  { %1761 = shalt.err (!%p1758_p7)
}
 0x56f   :  { %1333 = dma.vmem_to_hbm [thread:$0]  %s1331_s27, 128, %s2340_s13, [#allocation3]  }
 0x570   :  { %1762 = dma.done.wait [#allocation3], 128  }
 0x571   :  { %1763 = vsyncadd [#allocation3], 4294967168 }
 0x572   :  { %1337 = vsyncpa [#allocation3], 1 }

</bundles_post_ra>
